<compile_context>
chip_gen: v6e
topology: v6e:2x2x1
jax: 0.10.0
libtpu: 0.0.40
codegen_flags: <defaults>
</compile_context>

<pallas_src>
import math

import jax
import jax.numpy as jnp
from jax.experimental import pallas as pl
from jax.experimental.pallas import tpu as pltpu

# ----------------------------- config (small shapes) -----------------------------
BATCH = 2        # batch_size
FRAMES = 8       # frames per clip
CHANNELS = 4     # image channels
H = W = 8        # spatial
FEAT = 32        # stand-in for ResNet-50's 2048-d feature
K_DIM = 16       # args.proj_dim[-1] == args.k
T_SCALE = 10.0   # args.t
COEFF = 0.1      # args.coeff (used by the get_K stand-in)

LANE = 128                   # TPU lane width
FEAT_PAD = max(FEAT, LANE)   # kernel-facing (lane-dense) feature width
K_PAD = max(K_DIM, LANE)     # kernel-facing (lane-dense) projection width


# ----------------------------- fused forward kernel -------------------------------
def make_neuralefclr_kernel(k_dim, t_scale, coeff):
    sqrt_t = math.sqrt(t_scale)

    def kernel(x1_ref, x2_ref, wg_ref, wp_ref, b_ref,
               i1_ref, i2_ref, bid1_ref, bid2_ref,
               pkp_ref, loss_ref, reg_ref, normsq_ref):
        # x1/x2: (N, C*HW)  wg: (C*HW, FEAT_PAD)  wp: (FEAT_PAD, K_PAD)  b: (1, K_PAD)
        # i1/bid1: (N, 1)   i2/bid2: (1, N)
        # --- backbone stub: spatial GAP folded into wg -> one MXU contraction ---
        r1 = jnp.dot(x1_ref[...], wg_ref[...], preferred_element_type=jnp.float32)
        r2 = jnp.dot(x2_ref[...], wg_ref[...], preferred_element_type=jnp.float32)

        # --- projector: linear + bias (padded columns of wp/b are zero) ---
        z1 = jnp.dot(r1, wp_ref[...], preferred_element_type=jnp.float32) + b_ref[...]
        z2 = jnp.dot(r2, wp_ref[...], preferred_element_type=jnp.float32) + b_ref[...]

        # --- eigennorm normalization (training path) ---
        n = z1.shape[0]                                   # B*F
        norm_sqr = (jnp.sum(z1 * z1, axis=0, keepdims=True)
                    + jnp.sum(z2 * z2, axis=0, keepdims=True)) * (1.0 / (2.0 * n))
        normsq_ref[...] = norm_sqr
        # rsqrt on the EUP; the tiny floor only keeps the zero padded lanes
        # finite (real columns have norm^2 >> 1e-30, numerics unchanged).
        inv = jax.lax.rsqrt(jnp.maximum(norm_sqr, 1e-30)) * sqrt_t
        psi1 = z1 * inv
        psi2 = z2 * inv

        # --- block-diagonal K over all batches at once (get_K stand-in) ---
        diff = i1_ref[...] - i2_ref[...]                  # (N, N)
        k_full = jnp.exp(-coeff * diff * diff)            # EUP exp
        same_batch = bid1_ref[...] == bid2_ref[...]       # (N, N) batch-block mask
        k_bd = jnp.where(same_batch, k_full, 0.0)

        # sum_b psi2_b^T K_b psi1_b == psi2^T K_bd psi1 (and symmetrically)
        dn = (((0,), (0,)), ((), ()))                     # contract over frame axis
        kp1 = jnp.dot(k_bd, psi1, preferred_element_type=jnp.float32)
        kp2 = jnp.dot(k_bd, psi2, preferred_element_type=jnp.float32)
        acc21 = jax.lax.dot_general(psi2, kp1, dn,
                                    preferred_element_type=jnp.float32)  # psi_K_psi
        acc12 = jax.lax.dot_general(psi1, kp2, dn,
                                    preferred_element_type=jnp.float32)

        kp = acc21.shape[0]
        row = jax.lax.broadcasted_iota(jnp.int32, (kp, kp), 0)
        col = jax.lax.broadcasted_iota(jnp.int32, (kp, kp), 1)
        diag_sum = jnp.sum(jnp.where(row == col, acc21, 0.0))
        triu = col > row                                  # strict upper (.triu(1))
        reg = (jnp.sum(jnp.where(triu, acc21 * acc21, 0.0))
               + jnp.sum(jnp.where(triu, acc12 * acc12, 0.0)))

        pkp_ref[...] = acc21
        # normalization by psi_K_psi_diag.numel() == K_DIM (padded lanes are 0,
        # matching the reference: loss /= numel, reg /= numel).
        loss_ref[0, 0] = -2.0 * diag_sum / k_dim
        reg_ref[0, 0] = reg / k_dim

    return kernel


def neuralefclr_pallas(x1, x2, w_gap, w_proj, b_proj, i1, i2, bid1, bid2):
    kp = w_proj.shape[1]
    vmem = pl.BlockSpec(memory_space=pltpu.MemorySpace.VMEM)
    smem = pl.BlockSpec(memory_space=pltpu.MemorySpace.SMEM)
    kernel = make_neuralefclr_kernel(K_DIM, T_SCALE, COEFF)
    return pl.pallas_call(
        kernel,
        in_specs=[vmem] * 9,
        out_specs=(vmem, smem, smem, vmem),
        out_shape=(
            jax.ShapeDtypeStruct((kp, kp), jnp.float32),   # psi_K_psi (padded)
            jax.ShapeDtypeStruct((1, 1), jnp.float32),     # loss
            jax.ShapeDtypeStruct((1, 1), jnp.float32),     # reg
            jax.ShapeDtypeStruct((1, kp), jnp.float32),    # norm^2 (padded)
        ),
    )(x1, x2, w_gap, w_proj, b_proj, i1, i2, bid1, bid2)


# ----------------------------- model forward (glue) --------------------------------
def neuralefclr_forward(params, y1, y2, ind1, ind2):
    batch_size, frames, channels, row, col = y1.shape
    n = batch_size * frames
    hw = row * col

    # y.view(B*F, C, H, W) flattened to (N, C*HW); the two views stay separate
    # kernel inputs (no wrapper-side concatenate / extra HBM copy).
    x1 = y1.reshape(n, channels * hw).astype(jnp.float32)
    x2 = y2.reshape(n, channels * hw).astype(jnp.float32)

    # Kernel-facing, lane-dense weights:
    #   * GAP folded into the backbone weight: w_gap[c*HW+s, f] = w[c, f] / HW
    #   * FEAT and k zero-padded to 128 lanes (sliced back after the kernel).
    w_gap = jnp.broadcast_to((params["w_backbone"] / hw)[:, None, :],
                             (channels, hw, FEAT)).reshape(channels * hw, FEAT)
    w_gap = jnp.pad(w_gap, ((0, 0), (0, FEAT_PAD - FEAT)))
    w_proj = jnp.pad(params["w_proj"], ((0, FEAT_PAD - FEAT), (0, K_PAD - K_DIM)))
    b_proj = jnp.pad(params["b_proj"], ((0, 0), (0, K_PAD - K_DIM)))

    # Flattened frame indices + batch ids for the in-kernel block-diagonal K.
    i1 = ind1.astype(jnp.float32).reshape(n, 1)
    i2 = ind2.astype(jnp.float32).reshape(1, n)
    bid = jnp.repeat(jnp.arange(batch_size, dtype=jnp.float32), frames)
    bid1 = bid.reshape(n, 1)
    bid2 = bid.reshape(1, n)

    pkp, loss, reg, norm_sqr = neuralefclr_pallas(
        x1, x2, w_gap, w_proj, b_proj, i1, i2, bid1, bid2)

    pkp = pkp[:K_DIM, :K_DIM]
    # reference: B = y1.shape[0] after the view == batch_size * frames
    eigenvalues = jnp.diagonal(pkp) / (n ** 2)
    return loss[0, 0], reg[0, 0], eigenvalues, norm_sqr[0, :K_DIM]


# ----------------------------- deterministic params & run --------------------------
def init_params(key):
    k1, k2, k3 = jax.random.split(key, 3)
    return {
        "w_backbone": jax.random.normal(k1, (CHANNELS, FEAT), jnp.float32)
                      / math.sqrt(CHANNELS),
        "w_proj": jax.random.normal(k2, (FEAT, K_DIM), jnp.float32)
                  / math.sqrt(FEAT),
        "b_proj": 0.01 * jax.random.normal(k3, (1, K_DIM), jnp.float32),
    }


if __name__ == "__main__":
    key = jax.random.PRNGKey(0)
    kp_, ky1, ky2 = jax.random.split(key, 3)

    params = init_params(kp_)
    y1 = jax.random.normal(ky1, (BATCH, FRAMES, CHANNELS, H, W), jnp.float32)
    y2 = jax.random.normal(ky2, (BATCH, FRAMES, CHANNELS, H, W), jnp.float32)
    ind1 = jnp.tile(jnp.arange(FRAMES, dtype=jnp.int32), (BATCH, 1))
    ind2 = ind1 + 1                                              # shifted frame ids

    fwd = jax.jit(neuralefclr_forward)
    loss, reg, eigenvalues, norm_sqr = fwd(params, y1, y2, ind1, ind2)
    jax.block_until_ready((loss, reg, eigenvalues, norm_sqr))
    print("KERNEL_OK")
</pallas_src>

<mosaic_0001>
module attributes {stable_mosaic.version = 11 : i64} {
  func.func @kernel(%arg0: memref<16x256xf32, #tpu.memory_space<vmem>>, %arg1: memref<16x256xf32, #tpu.memory_space<vmem>>, %arg2: memref<256x128xf32, #tpu.memory_space<vmem>>, %arg3: memref<128x128xf32, #tpu.memory_space<vmem>>, %arg4: memref<1x128xf32, #tpu.memory_space<vmem>>, %arg5: memref<16x1xf32, #tpu.memory_space<vmem>>, %arg6: memref<1x16xf32, #tpu.memory_space<vmem>>, %arg7: memref<16x1xf32, #tpu.memory_space<vmem>>, %arg8: memref<1x16xf32, #tpu.memory_space<vmem>>, %arg9: memref<128x128xf32, #tpu.memory_space<vmem>>, %arg10: memref<1x1xf32, #tpu.memory_space<smem>>, %arg11: memref<1x1xf32, #tpu.memory_space<smem>>, %arg12: memref<1x128xf32, #tpu.memory_space<vmem>>) attributes {dimension_semantics = [], scalar_prefetch = 0 : i64, scratch_operands = 0 : i64, tpu.core_type = #tpu.core_type<tc>} {
    %c0 = arith.constant 0 : index
    %c0_0 = arith.constant 0 : index
    %0 = vector.load %arg0[%c0, %c0_0] : memref<16x256xf32, #tpu.memory_space<vmem>>, vector<16x256xf32>
    %c0_1 = arith.constant 0 : index
    %c0_2 = arith.constant 0 : index
    %1 = vector.load %arg2[%c0_1, %c0_2] : memref<256x128xf32, #tpu.memory_space<vmem>>, vector<256x128xf32>
    %cst = arith.constant dense<0.000000e+00> : vector<16x128xf32>
    %2 = tpu.matmul %0, %1, %cst {dimension_numbers = #tpu.dot_dimension_numbers<[1], [0], [0], [1], [0, 0, 1, 1], [], []>} : vector<16x256xf32>, vector<256x128xf32>, vector<16x128xf32> -> vector<16x128xf32>
    %c0_3 = arith.constant 0 : index
    %c0_4 = arith.constant 0 : index
    %3 = vector.load %arg1[%c0_3, %c0_4] : memref<16x256xf32, #tpu.memory_space<vmem>>, vector<16x256xf32>
    %c0_5 = arith.constant 0 : index
    %c0_6 = arith.constant 0 : index
    %4 = vector.load %arg2[%c0_5, %c0_6] : memref<256x128xf32, #tpu.memory_space<vmem>>, vector<256x128xf32>
    %cst_7 = arith.constant dense<0.000000e+00> : vector<16x128xf32>
    %5 = tpu.matmul %3, %4, %cst_7 {dimension_numbers = #tpu.dot_dimension_numbers<[1], [0], [0], [1], [0, 0, 1, 1], [], []>} : vector<16x256xf32>, vector<256x128xf32>, vector<16x128xf32> -> vector<16x128xf32>
    %c0_8 = arith.constant 0 : index
    %c0_9 = arith.constant 0 : index
    %6 = vector.load %arg3[%c0_8, %c0_9] : memref<128x128xf32, #tpu.memory_space<vmem>>, vector<128x128xf32>
    %cst_10 = arith.constant dense<0.000000e+00> : vector<16x128xf32>
    %7 = tpu.matmul %2, %6, %cst_10 {dimension_numbers = #tpu.dot_dimension_numbers<[1], [0], [0], [1], [0, 0, 1, 1], [], []>} : vector<16x128xf32>, vector<128x128xf32>, vector<16x128xf32> -> vector<16x128xf32>
    %c0_11 = arith.constant 0 : index
    %c0_12 = arith.constant 0 : index
    %8 = vector.load %arg4[%c0_11, %c0_12] : memref<1x128xf32, #tpu.memory_space<vmem>>, vector<1x128xf32>
    %9 = vector.broadcast %8 : vector<1x128xf32> to vector<16x128xf32>
    %10 = arith.addf %7, %9 : vector<16x128xf32>
    %c0_13 = arith.constant 0 : index
    %c0_14 = arith.constant 0 : index
    %11 = vector.load %arg3[%c0_13, %c0_14] : memref<128x128xf32, #tpu.memory_space<vmem>>, vector<128x128xf32>
    %cst_15 = arith.constant dense<0.000000e+00> : vector<16x128xf32>
    %12 = tpu.matmul %5, %11, %cst_15 {dimension_numbers = #tpu.dot_dimension_numbers<[1], [0], [0], [1], [0, 0, 1, 1], [], []>} : vector<16x128xf32>, vector<128x128xf32>, vector<16x128xf32> -> vector<16x128xf32>
    %c0_16 = arith.constant 0 : index
    %c0_17 = arith.constant 0 : index
    %13 = vector.load %arg4[%c0_16, %c0_17] : memref<1x128xf32, #tpu.memory_space<vmem>>, vector<1x128xf32>
    %14 = vector.broadcast %13 : vector<1x128xf32> to vector<16x128xf32>
    %15 = arith.addf %12, %14 : vector<16x128xf32>
    %16 = arith.mulf %10, %10 : vector<16x128xf32>
    %cst_18 = arith.constant dense<0.000000e+00> : vector<128xf32>
    %17 = vector.multi_reduction <add>, %16, %cst_18 [0] : vector<16x128xf32> to vector<128xf32>
    %18 = vector.shape_cast %17 : vector<128xf32> to vector<1x128xf32>
    %19 = arith.mulf %15, %15 : vector<16x128xf32>
    %cst_19 = arith.constant dense<0.000000e+00> : vector<128xf32>
    %20 = vector.multi_reduction <add>, %19, %cst_19 [0] : vector<16x128xf32> to vector<128xf32>
    %21 = vector.shape_cast %20 : vector<128xf32> to vector<1x128xf32>
    %22 = arith.addf %18, %21 : vector<1x128xf32>
    %cst_20 = arith.constant 3.125000e-02 : f32
    %23 = vector.broadcast %cst_20 : f32 to vector<1x128xf32>
    %24 = arith.mulf %22, %23 : vector<1x128xf32>
    %c0_21 = arith.constant 0 : index
    %c0_22 = arith.constant 0 : index
    %25 = vector.load %arg12[%c0_21, %c0_22] : memref<1x128xf32, #tpu.memory_space<vmem>>, vector<1x128xf32>
    tpu.vector_store %arg12[%c0_21, %c0_22], %24 {strides = array<i32>} : memref<1x128xf32, #tpu.memory_space<vmem>>, vector<1x128xf32>,
    %cst_23 = arith.constant 1.000000e-30 : f32
    %26 = vector.broadcast %cst_23 : f32 to vector<1x128xf32>
    %27 = arith.maximumf %24, %26 : vector<1x128xf32>
    %28 = math.rsqrt %27 : vector<1x128xf32>
    %cst_24 = arith.constant 3.1622777 : f32
    %29 = vector.broadcast %cst_24 : f32 to vector<1x128xf32>
    %30 = arith.mulf %28, %29 : vector<1x128xf32>
    %31 = vector.broadcast %30 : vector<1x128xf32> to vector<16x128xf32>
    %32 = arith.mulf %10, %31 : vector<16x128xf32>
    %33 = vector.broadcast %30 : vector<1x128xf32> to vector<16x128xf32>
    %34 = arith.mulf %15, %33 : vector<16x128xf32>
    %c0_25 = arith.constant 0 : index
    %c0_26 = arith.constant 0 : index
    %35 = vector.load %arg5[%c0_25, %c0_26] : memref<16x1xf32, #tpu.memory_space<vmem>>, vector<16x1xf32>
    %c0_27 = arith.constant 0 : index
    %c0_28 = arith.constant 0 : index
    %36 = vector.load %arg6[%c0_27, %c0_28] : memref<1x16xf32, #tpu.memory_space<vmem>>, vector<1x16xf32>
    %37 = vector.broadcast %35 : vector<16x1xf32> to vector<16x16xf32>
    %38 = vector.broadcast %36 : vector<1x16xf32> to vector<16x16xf32>
    %39 = arith.subf %37, %38 : vector<16x16xf32>
    %cst_29 = arith.constant -1.000000e-01 : f32
    %40 = vector.broadcast %cst_29 : f32 to vector<16x16xf32>
    %41 = arith.mulf %40, %39 : vector<16x16xf32>
    %42 = arith.mulf %41, %39 : vector<16x16xf32>
    %43 = math.exp %42 : vector<16x16xf32>
    %c0_30 = arith.constant 0 : index
    %c0_31 = arith.constant 0 : index
    %44 = vector.load %arg7[%c0_30, %c0_31] : memref<16x1xf32, #tpu.memory_space<vmem>>, vector<16x1xf32>
    %c0_32 = arith.constant 0 : index
    %c0_33 = arith.constant 0 : index
    %45 = vector.load %arg8[%c0_32, %c0_33] : memref<1x16xf32, #tpu.memory_space<vmem>>, vector<1x16xf32>
    %46 = vector.broadcast %44 : vector<16x1xf32> to vector<16x16xf32>
    %47 = vector.broadcast %45 : vector<1x16xf32> to vector<16x16xf32>
    %48 = arith.cmpf oeq, %46, %47 : vector<16x16xf32>
    %cst_34 = arith.constant 0.000000e+00 : f32
    %49 = vector.broadcast %cst_34 : f32 to vector<16x16xf32>
    %50 = arith.select %48, %43, %49 : vector<16x16xi1>, vector<16x16xf32>
    %cst_35 = arith.constant dense<0.000000e+00> : vector<16x128xf32>
    %51 = tpu.matmul %50, %32, %cst_35 {dimension_numbers = #tpu.dot_dimension_numbers<[1], [0], [0], [1], [0, 0, 1, 1], [], []>} : vector<16x16xf32>, vector<16x128xf32>, vector<16x128xf32> -> vector<16x128xf32>
    %cst_36 = arith.constant dense<0.000000e+00> : vector<16x128xf32>
    %52 = tpu.matmul %50, %34, %cst_36 {dimension_numbers = #tpu.dot_dimension_numbers<[1], [0], [0], [1], [0, 0, 1, 1], [], []>} : vector<16x16xf32>, vector<16x128xf32>, vector<16x128xf32> -> vector<16x128xf32>
    %cst_37 = arith.constant dense<0.000000e+00> : vector<128x128xf32>
    %53 = tpu.matmul %34, %51, %cst_37 {dimension_numbers = #tpu.dot_dimension_numbers<[0], [0], [1], [1], [0, 1, 1, 1], [], []>} : vector<16x128xf32>, vector<16x128xf32>, vector<128x128xf32> -> vector<128x128xf32>
    %cst_38 = arith.constant dense<0.000000e+00> : vector<128x128xf32>
    %54 = tpu.matmul %32, %52, %cst_38 {dimension_numbers = #tpu.dot_dimension_numbers<[0], [0], [1], [1], [0, 1, 1, 1], [], []>} : vector<16x128xf32>, vector<16x128xf32>, vector<128x128xf32> -> vector<128x128xf32>
    %55 = tpu.iota {dimensions = array<i32: 0>} : vector<128x128xi32>
    %56 = tpu.iota {dimensions = array<i32: 1>} : vector<128x128xi32>
    %57 = arith.cmpi eq, %55, %56 : vector<128x128xi32>
    %cst_39 = arith.constant 0.000000e+00 : f32
    %58 = vector.broadcast %cst_39 : f32 to vector<128x128xf32>
    %59 = arith.select %57, %53, %58 : vector<128x128xi1>, vector<128x128xf32>
    %60 = vector.shape_cast %59 : vector<128x128xf32> to vector<1x128x128xf32>
    %cst_40 = arith.constant dense<0.000000e+00> : vector<1xf32>
    %61 = vector.multi_reduction <add>, %60, %cst_40 [1, 2] : vector<1x128x128xf32> to vector<1xf32>
    %62 = vector.shape_cast %61 : vector<1xf32> to vector<1x1x1xf32>
    %63 = vector.extract %62[0, 0, 0] : f32 from vector<1x1x1xf32>
    %64 = arith.cmpi sgt, %56, %55 : vector<128x128xi32>
    %65 = arith.mulf %53, %53 : vector<128x128xf32>
    %cst_41 = arith.constant 0.000000e+00 : f32
    %66 = vector.broadcast %cst_41 : f32 to vector<128x128xf32>
    %67 = arith.select %64, %65, %66 : vector<128x128xi1>, vector<128x128xf32>
    %68 = vector.shape_cast %67 : vector<128x128xf32> to vector<1x128x128xf32>
    %cst_42 = arith.constant dense<0.000000e+00> : vector<1xf32>
    %69 = vector.multi_reduction <add>, %68, %cst_42 [1, 2] : vector<1x128x128xf32> to vector<1xf32>
    %70 = vector.shape_cast %69 : vector<1xf32> to vector<1x1x1xf32>
    %71 = vector.extract %70[0, 0, 0] : f32 from vector<1x1x1xf32>
    %72 = arith.mulf %54, %54 : vector<128x128xf32>
    %cst_43 = arith.constant 0.000000e+00 : f32
    %73 = vector.broadcast %cst_43 : f32 to vector<128x128xf32>
    %74 = arith.select %64, %72, %73 : vector<128x128xi1>, vector<128x128xf32>
    %75 = vector.shape_cast %74 : vector<128x128xf32> to vector<1x128x128xf32>
    %cst_44 = arith.constant dense<0.000000e+00> : vector<1xf32>
    %76 = vector.multi_reduction <add>, %75, %cst_44 [1, 2] : vector<1x128x128xf32> to vector<1xf32>
    %77 = vector.shape_cast %76 : vector<1xf32> to vector<1x1x1xf32>
    %78 = vector.extract %77[0, 0, 0] : f32 from vector<1x1x1xf32>
    %79 = arith.addf %71, %78 : f32
    %c0_45 = arith.constant 0 : index
    %c0_46 = arith.constant 0 : index
    %80 = vector.load %arg9[%c0_45, %c0_46] : memref<128x128xf32, #tpu.memory_space<vmem>>, vector<128x128xf32>
    tpu.vector_store %arg9[%c0_45, %c0_46], %53 {strides = array<i32>} : memref<128x128xf32, #tpu.memory_space<vmem>>, vector<128x128xf32>,
    %cst_47 = arith.constant -2.000000e+00 : f32
    %81 = arith.mulf %cst_47, %63 : f32
    %cst_48 = arith.constant 1.600000e+01 : f32
    %82 = arith.divf %81, %cst_48 : f32
    %c0_49 = arith.constant 0 : index
    %c0_50 = arith.constant 0 : index
    %83 = memref.load %arg10[%c0_49, %c0_50] : memref<1x1xf32, #tpu.memory_space<smem>>
    memref.store %82, %arg10[%c0_49, %c0_50] : memref<1x1xf32, #tpu.memory_space<smem>>
    %cst_51 = arith.constant 1.600000e+01 : f32
    %84 = arith.divf %79, %cst_51 : f32
    %c0_52 = arith.constant 0 : index
    %c0_53 = arith.constant 0 : index
    %85 = memref.load %arg11[%c0_52, %c0_53] : memref<1x1xf32, #tpu.memory_space<smem>>
    memref.store %84, %arg11[%c0_52, %c0_53] : memref<1x1xf32, #tpu.memory_space<smem>>
    return
  }
}

</mosaic_0001>

<bundles_post_ra>
// kernel: neuralefclr_forward.1
= control target key start
LH: loop header
LB: loop body
LE: loop exit
PB: predicated region body
PF: predicated region fallthrough
CT: control target
= control target key end

     0   :  { %18 = vsyncpa [#allocation3], 0  ;;  %s2297_s0 = inlined_call_operand.vmem [shape: f32[16,256], index: 0, kind: input, shape index: {}]   ;;  %s2298_s1 = inlined_call_operand.vmem [shape: f32[16,256], index: 1, kind: input, shape index: {}]   ;;  %s2299_s2 = inlined_call_operand.vmem [shape: f32[256,128], index: 2, kind: input, shape index: {}]   ;;  %s2300_s3 = inlined_call_operand.vmem [shape: f32[128,128], index: 3, kind: input, shape index: {}]   ;;  %s2301_s4 = inlined_call_operand.vmem [shape: f32[1,128], index: 4, kind: input, shape index: {}]   ;;  %s2302_s5 = inlined_call_operand.vmem [shape: f32[16,1], index: 5, kind: input, shape index: {}]   ;;  %s2303_s6 = inlined_call_operand.vmem [shape: f32[1,16], index: 6, kind: input, shape index: {}]   ;;  %s2304_s7 = inlined_call_operand.vmem [shape: f32[16,1], index: 7, kind: input, shape index: {}]   ;;  %s2305_s8 = inlined_call_operand.vmem [shape: f32[1,16], index: 8, kind: input, shape index: {}]   ;;  %s2306_s9 = inlined_call_operand.vmem [shape: f32[128,128], index: 9, kind: output, shape index: {0}]   ;;  %s2307_s10 = inlined_call_operand.hbm [shape: f32[1,1], index: 10, kind: output, shape index: {1}]   ;;  %s2308_s11 = inlined_call_operand.hbm [shape: f32[1,1], index: 11, kind: output, shape index: {2}]   ;;  %s2309_s12 = inlined_call_operand.vmem [shape: f32[1,128], index: 12, kind: output, shape index: {3}]  }
   0x1   :  { %v73_v0 = vld [vmem:[%s2299_s2 + $0xf8] sm:$0xff]  ;;  %v72_v2 = vld [vmem:[%s2299_s2 + $0xf0] sm:$0xff]  ;;  %v71_v4 = vld [vmem:[%s2299_s2 + $0xe8] sm:$0xff] }
   0x2   :  { %v57_v1 = vld [vmem:[%s2299_s2 + $0x78] sm:$0xff]  ;;  %1391 = vmatprep.subr.mxu0 %v73_v0  ;;  %1429 = vmatprep.subr.mxu1 %v73_v0  ;;  %v56_v3 = vld [vmem:[%s2299_s2 + $0x70] sm:$0xff]  ;;  %v55_v5 = vld [vmem:[%s2299_s2 + $0x68] sm:$0xff] }
   0x3   :  { %1392 = vmatpush3.msra.mxu0 %v57_v1  ;;  %1430 = vmatpush3.msra.mxu1 %v57_v1  ;;  %v70_v6 = vld [vmem:[%s2299_s2 + $0xe0] sm:$0xff]  ;;  %v69_v8 = vld [vmem:[%s2299_s2 + $0xd8] sm:$0xff]  ;;  %v68_v10 = vld [vmem:[%s2299_s2 + $0xd0] sm:$0xff] }
   0x4   :  { %1393 = vmatprep.subr.mxu0 %v72_v2  ;;  %1431 = vmatprep.subr.mxu1 %v72_v2  ;;  %v54_v7 = vld [vmem:[%s2299_s2 + $0x60] sm:$0xff]  ;;  %v53_v9 = vld [vmem:[%s2299_s2 + $0x58] sm:$0xff]  ;;  %v52_v11 = vld [vmem:[%s2299_s2 + $0x50] sm:$0xff] }
   0x5   :  { %1394 = vmatpush3.msra.mxu0 %v56_v3  ;;  %1432 = vmatpush3.msra.mxu1 %v56_v3  ;;  %v67_v12 = vld [vmem:[%s2299_s2 + $0xc8] sm:$0xff]  ;;  %v66_v14 = vld [vmem:[%s2299_s2 + $0xc0] sm:$0xff]  ;;  %v65_v16 = vld [vmem:[%s2299_s2 + $0xb8] sm:$0xff] }
   0x6   :  { %1395 = vmatprep.subr.mxu0 %v71_v4  ;;  %1433 = vmatprep.subr.mxu1 %v71_v4  ;;  %v51_v13 = vld [vmem:[%s2299_s2 + $0x48] sm:$0xff]  ;;  %v50_v15 = vld [vmem:[%s2299_s2 + $0x40] sm:$0xff]  ;;  %v49_v17 = vld [vmem:[%s2299_s2 + $0x38] sm:$0xff] }
   0x7   :  { %1396 = vmatpush3.msra.mxu0 %v55_v5  ;;  %1434 = vmatpush3.msra.mxu1 %v55_v5  ;;  %v64_v18 = vld [vmem:[%s2299_s2 + $0xb0] sm:$0xff] }
   0x8   :  { %1397 = vmatprep.subr.mxu0 %v70_v6  ;;  %1435 = vmatprep.subr.mxu1 %v70_v6  ;;  %v48_v19 = vld [vmem:[%s2299_s2 + $0x30] sm:$0xff] }
   0x9   :  { %1398 = vmatpush3.msra.mxu0 %v54_v7  ;;  %1436 = vmatpush3.msra.mxu1 %v54_v7 }
   0xa   :  { %1399 = vmatprep.subr.mxu0 %v69_v8  ;;  %1437 = vmatprep.subr.mxu1 %v69_v8 }
   0xb   :  { %1400 = vmatpush3.msra.mxu0 %v53_v9  ;;  %1438 = vmatpush3.msra.mxu1 %v53_v9 }
   0xc   :  { %1401 = vmatprep.subr.mxu0 %v68_v10  ;;  %1439 = vmatprep.subr.mxu1 %v68_v10 }
   0xd   :  { %1402 = vmatpush3.msra.mxu0 %v52_v11  ;;  %1440 = vmatpush3.msra.mxu1 %v52_v11 }
   0xe   :  { %1403 = vmatprep.subr.mxu0 %v67_v12  ;;  %1441 = vmatprep.subr.mxu1 %v67_v12 }
   0xf   :  { %1404 = vmatpush3.msra.mxu0 %v51_v13  ;;  %1442 = vmatpush3.msra.mxu1 %v51_v13 }
  0x10   :  { %1405 = vmatprep.subr.mxu0 %v66_v14  ;;  %1443 = vmatprep.subr.mxu1 %v66_v14 }
  0x11   :  { %1406 = vmatpush3.msra.mxu0 %v50_v15  ;;  %1444 = vmatpush3.msra.mxu1 %v50_v15 }
  0x12   :  { %1407 = vmatprep.subr.mxu0 %v65_v16  ;;  %1445 = vmatprep.subr.mxu1 %v65_v16 }
  0x13   :  { %19 = vsyncpa [#allocation5], 0  ;;  %1408 = vmatpush3.msra.mxu0 %v49_v17  ;;  %1446 = vmatpush3.msra.mxu1 %v49_v17  ;;  %v63_v20 = vld [vmem:[%s2299_s2 + $0xa8] sm:$0xff]  ;;  %v62_v22 = vld [vmem:[%s2299_s2 + $0xa0] sm:$0xff]  ;;  %v1725_v58 = vmov 0   ;;  %vm481_vm2 = vcmask 130048  }
  0x14   :  { %1409 = vmatprep.subr.mxu0 %v64_v18  ;;  %1447 = vmatprep.subr.mxu1 %v64_v18  ;;  %v47_v21 = vld [vmem:[%s2299_s2 + $0x28] sm:$0xff]  ;;  %v46_v23 = vld [vmem:[%s2299_s2 + $0x20] sm:$0xff]  ;;  %v61_v24 = vld [vmem:[%s2299_s2 + $0x98] sm:$0xff]  ;;  %s1726_s17 = smov [#allocation2]   ;;  %s1727_s20 = smov [#allocation4]  }
  0x15   :  { %1410 = vmatpush3.msra.mxu0 %v48_v19  ;;  %1448 = vmatpush3.msra.mxu1 %v48_v19  ;;  %v45_v25 = vld [vmem:[%s2299_s2 + $0x18] sm:$0xff]  ;;  %v60_v26 = vld [vmem:[%s2299_s2 + $0x90] sm:$0xff]  ;;  %v59_v28 = vld [vmem:[%s2299_s2 + $0x88] sm:$0xff] }
  0x16   :  { %1411 = vmatprep.subr.mxu0 %v63_v20  ;;  %1449 = vmatprep.subr.mxu1 %v63_v20  ;;  %v44_v27 = vld [vmem:[%s2299_s2 + $0x10] sm:$0xff]  ;;  %v43_v29 = vld [vmem:[%s2299_s2 + $0x8] sm:$0xff]  ;;  %v58_v30 = vld [vmem:[%s2299_s2 + $0x80] sm:$0xff] }
  0x17   :  { %1412 = vmatpush3.msra.mxu0 %v47_v21  ;;  %1450 = vmatpush3.msra.mxu1 %v47_v21  ;;  %v42_v31 = vld [vmem:[%s2299_s2] sm:$0xff]  ;;  %v39_v32 = vld [vmem:[%s2297_s0 + $0x8] sm:$0xff]  ;;  %v41_v36 = vld [vmem:[%s2297_s0 + $0x18] sm:$0xff] }
  0x18   :  { %1413 = vmatprep.subr.mxu0 %v62_v22  ;;  %1451 = vmatprep.subr.mxu1 %v62_v22  ;;  %v150_v33 = vld [vmem:[%s2298_s1 + $0x8] sm:$0xff]  ;;  %v38_v34 = vld [vmem:[%s2297_s0] sm:$0xff]  ;;  %v152_v37 = vld [vmem:[%s2298_s1 + $0x18] sm:$0xff] }
  0x19   :  { %1414 = vmatpush3.msra.mxu0 %v46_v23  ;;  %1452 = vmatpush3.msra.mxu1 %v46_v23  ;;  %v149_v35 = vld [vmem:[%s2298_s1] sm:$0xff]  ;;  %v243_v38 = vld [vmem:[%s2300_s3 + $0x78] sm:$0xff]  ;;  %v40_v39 = vld [vmem:[%s2297_s0 + $0x10] sm:$0xff] }
  0x1a   :  { %1415 = vmatprep.subr.mxu0 %v61_v24  ;;  %1453 = vmatprep.subr.mxu1 %v61_v24  ;;  %v151_v40 = vld [vmem:[%s2298_s1 + $0x10] sm:$0xff]  ;;  %v241_v42 = vld [vmem:[%s2300_s3 + $0x68] sm:$0xff]  ;;  %v240_v43 = vld [vmem:[%s2300_s3 + $0x60] sm:$0xff] }
  0x1b   :  { %1416 = vmatpush3.msra.mxu0 %v45_v25  ;;  %1454 = vmatpush3.msra.mxu1 %v45_v25  ;;  %v242_v41 = vld [vmem:[%s2300_s3 + $0x70] sm:$0xff]  ;;  %v239_v44 = vld [vmem:[%s2300_s3 + $0x58] sm:$0xff]  ;;  %v237_v46 = vld [vmem:[%s2300_s3 + $0x48] sm:$0xff] }
  0x1c   :  { %1417 = vmatprep.subr.mxu0 %v60_v26  ;;  %1455 = vmatprep.subr.mxu1 %v60_v26  ;;  %v238_v45 = vld [vmem:[%s2300_s3 + $0x50] sm:$0xff]  ;;  %v236_v47 = vld [vmem:[%s2300_s3 + $0x40] sm:$0xff]  ;;  %v235_v48 = vld [vmem:[%s2300_s3 + $0x38] sm:$0xff] }
  0x1d   :  { %1418 = vmatpush3.msra.mxu0 %v44_v27  ;;  %1456 = vmatpush3.msra.mxu1 %v44_v27  ;;  %v234_v49 = vld [vmem:[%s2300_s3 + $0x30] sm:$0xff]  ;;  %v233_v50 = vld [vmem:[%s2300_s3 + $0x28] sm:$0xff]  ;;  %v232_v51 = vld [vmem:[%s2300_s3 + $0x20] sm:$0xff] }
  0x1e   :  { %1419 = vmatprep.subr.mxu0 %v59_v28  ;;  %1457 = vmatprep.subr.mxu1 %v59_v28  ;;  %v231_v52 = vld [vmem:[%s2300_s3 + $0x18] sm:$0xff]  ;;  %v230_v53 = vld [vmem:[%s2300_s3 + $0x10] sm:$0xff]  ;;  %v229_v54 = vld [vmem:[%s2300_s3 + $0x8] sm:$0xff] }
  0x1f   :  { %1420 = vmatpush3.msra.mxu0 %v43_v29  ;;  %1458 = vmatpush3.msra.mxu1 %v43_v29  ;;  %v228_v55 = vld [vmem:[%s2300_s3] sm:$0xff]  ;;  %v430_v59 = vld [vmem:[%s2302_s5 + $0x8] sm:$0xff] }
  0x20   :  { %1421 = vmatprep.subr.mxu0 %v58_v30  ;;  %1459 = vmatprep.subr.mxu1 %v58_v30  ;;  %v429_v56 = vld [vmem:[%s2302_s5] sm:$0xff]  ;;  %v459_v60 = vld [vmem:[%s2304_s7 + $0x8] sm:$0xff] }
  0x21   :  { %1422 = vmatpush3.msra.mxu0 %v42_v31  ;;  %138 = vmatprep.mubr.f32.mxu0 %v39_v32  ;;  %v458_v57 = vld [vmem:[%s2304_s7] sm:$0xff] }
  0x22   :  { %1460 = vmatpush3.msra.mxu1 %v42_v31  ;;  %217 = vmatprep.mubr.f32.mxu1 %v150_v33  ;;  %v1353_v10 = vld [vmem:[%s2303_s6] ss:$0 sm:$0xff] }
  0x23   :  { %139 = vmatmul.mubr.f32.vlgmr.msra.gmra.mxu0 %v38_v34  ;;  %218 = vmatmul.mubr.f32.vlgmr.msra.gmra.mxu1 %v149_v35  ;;  %v1354_v21 = vld [vmem:[%s2305_s8] ss:$0 sm:$0xff] }
  0x24   :  { %143 = vmatprep.mubr.f32.mxu0 %v41_v36  ;;  %222 = vmatprep.mubr.f32.mxu1 %v152_v37  ;;  %v1352_v27 = vld [vmem:[%s2301_s4] ss:$0 sm:$0xff] }
  0x25   :  { %1547 = vmatprep.subr.mxu0 %v243_v38  ;;  %1582 = vmatprep.subr.mxu1 %v243_v38 }
  0x26   :  { %1548 = vmatpush3.msra.mxu0 %v243_v38  ;;  %1583 = vmatpush3.msra.mxu1 %v243_v38 }
  0x27   :  { %144 = vmatmul.mubr.f32.gmra.mxu0 %v40_v39  ;;  %223 = vmatmul.mubr.f32.gmra.mxu1 %v151_v40 }
  0x28   :  { %1549 = vmatprep.subr.mxu0 %v242_v41  ;;  %1584 = vmatprep.subr.mxu1 %v242_v41 }
  0x29   :  { %1550 = vmatpush3.msra.mxu0 %v242_v41  ;;  %1585 = vmatpush3.msra.mxu1 %v242_v41 }
  0x2a   :  { %1551 = vmatprep.subr.mxu0 %v241_v42  ;;  %1586 = vmatprep.subr.mxu1 %v241_v42 }
  0x2b   :  { %1552 = vmatpush3.msra.mxu0 %v241_v42  ;;  %1587 = vmatpush3.msra.mxu1 %v241_v42 }
  0x2c   :  { %1553 = vmatprep.subr.mxu0 %v240_v43  ;;  %1588 = vmatprep.subr.mxu1 %v240_v43 }
  0x2d   :  { %1554 = vmatpush3.msra.mxu0 %v240_v43  ;;  %1589 = vmatpush3.msra.mxu1 %v240_v43 }
  0x2e   :  { %1555 = vmatprep.subr.mxu0 %v239_v44  ;;  %1590 = vmatprep.subr.mxu1 %v239_v44 }
  0x2f   :  { %1556 = vmatpush3.msra.mxu0 %v239_v44  ;;  %1591 = vmatpush3.msra.mxu1 %v239_v44 }
  0x30   :  { %1557 = vmatprep.subr.mxu0 %v238_v45  ;;  %1592 = vmatprep.subr.mxu1 %v238_v45 }
  0x31   :  { %1558 = vmatpush3.msra.mxu0 %v238_v45  ;;  %1593 = vmatpush3.msra.mxu1 %v238_v45 }
  0x32   :  { %1559 = vmatprep.subr.mxu0 %v237_v46  ;;  %1594 = vmatprep.subr.mxu1 %v237_v46 }
  0x33   :  { %1560 = vmatpush3.msra.mxu0 %v237_v46  ;;  %1595 = vmatpush3.msra.mxu1 %v237_v46 }
  0x34   :  { %1561 = vmatprep.subr.mxu0 %v236_v47  ;;  %1596 = vmatprep.subr.mxu1 %v236_v47 }
  0x35   :  { %1562 = vmatpush3.msra.mxu0 %v236_v47  ;;  %1597 = vmatpush3.msra.mxu1 %v236_v47 }
  0x36   :  { %1563 = vmatprep.subr.mxu0 %v235_v48  ;;  %1598 = vmatprep.subr.mxu1 %v235_v48 }
  0x37   :  { %1564 = vmatpush3.msra.mxu0 %v235_v48  ;;  %1599 = vmatpush3.msra.mxu1 %v235_v48 }
  0x38   :  { %1565 = vmatprep.subr.mxu0 %v234_v49  ;;  %1600 = vmatprep.subr.mxu1 %v234_v49 }
  0x39   :  { %1566 = vmatpush3.msra.mxu0 %v234_v49  ;;  %1601 = vmatpush3.msra.mxu1 %v234_v49 }
  0x3a   :  { %1567 = vmatprep.subr.mxu0 %v233_v50  ;;  %1602 = vmatprep.subr.mxu1 %v233_v50 }
  0x3b   :  { %1568 = vmatpush3.msra.mxu0 %v233_v50  ;;  %1603 = vmatpush3.msra.mxu1 %v233_v50 }
  0x3c   :  { %1569 = vmatprep.subr.mxu0 %v232_v51  ;;  %1604 = vmatprep.subr.mxu1 %v232_v51 }
  0x3d   :  { %1570 = vmatpush3.msra.mxu0 %v232_v51  ;;  %1605 = vmatpush3.msra.mxu1 %v232_v51 }
  0x3e   :  { %1571 = vmatprep.subr.mxu0 %v231_v52  ;;  %1606 = vmatprep.subr.mxu1 %v231_v52 }
  0x3f   :  { %1572 = vmatpush3.msra.mxu0 %v231_v52  ;;  %1607 = vmatpush3.msra.mxu1 %v231_v52 }
  0x40   :  { %1573 = vmatprep.subr.mxu0 %v230_v53  ;;  %1608 = vmatprep.subr.mxu1 %v230_v53 }
  0x41   :  { %1574 = vmatpush3.msra.mxu0 %v230_v53  ;;  %1609 = vmatpush3.msra.mxu1 %v230_v53 }
  0x42   :  { %1575 = vmatprep.subr.mxu0 %v229_v54  ;;  %1610 = vmatprep.subr.mxu1 %v229_v54 }
  0x43   :  { %1576 = vmatpush3.msra.mxu0 %v229_v54  ;;  %1611 = vmatpush3.msra.mxu1 %v229_v54 }
  0x44   :  { %1577 = vmatprep.subr.mxu0 %v228_v55  ;;  %1612 = vmatprep.subr.mxu1 %v228_v55 }
  0x45   :  { %1578 = vmatpush3.msra.mxu0 %v228_v55  ;;  %1613 = vmatpush3.msra.mxu1 %v228_v55 }
  0x46   :  { %1697 = vset.pattern.permute.xlu0 %v1725_v58  ;;  %1698 = vset.pattern.permute.xlu1 %v1725_v58 }
  0x47   :  { %434 = vperm.xlu0 %1697, %v429_v56   ;;  %463 = vperm.xlu1 %1698, %v458_v57  }
  0x4b   :  { %439 = vperm.xlu0 %1697, %v430_v59   ;;  %468 = vperm.xlu1 %1698, %v459_v60  }
  0xc2   :  { %v435_v9 = vpop.permute.xlu0 %434  ;;  %v464_v20 = vpop.permute.xlu1 %463 }
  0xc3   :  { %v448_v12 = vsub.f32 %v435_v9, %v1353_v10  ;;  %vm477_vm0 = vcmp.eq.f32.partialorder %v464_v20, %v1354_v21 }
  0xc5   :  { %v450_v14 = vmul.f32 -0.1, %v448_v12 }
  0xc6   :  { %v440_v11 = vpop.permute.xlu0 %439  ;;  %v469_v22 = vpop.permute.xlu1 %468 }
  0xc7   :  { %v449_v13 = vsub.f32 %v440_v11, %v1353_v10  ;;  %v452_v16 = vmul.f32 %v450_v14, %v448_v12  ;;  %vm478_vm1 = vcmp.eq.f32.partialorder %v469_v22, %v1354_v21 }
  0xc9   :  { %v451_v15 = vmul.f32 -0.1, %v449_v13  ;;  %v454_v18 = vmul.f32 1.442695, %v452_v16 }
  0xcb   :  { %v453_v17 = vmul.f32 %v451_v15, %v449_v13  ;;  %1699 = vpow2.f32 %v454_v18 }
  0xcd   :  { %v456_v19 = vmul.f32 1.442695, %v453_v17 }
  0xcf   :  { %1701 = vpow2.f32 %v456_v19 }
  0xd8   :  { %v1700_v23 = vpop.eup %1699 }
  0xd9   :  { %v479_v25 = vsel %vm477_vm0, %v1700_v23, 0.0 }
  0xdc   :  { %v1702_v24 = vpop.eup %1701 }
  0xdd   :  { %v480_v26 = vsel %vm478_vm1, %v1702_v24, 0.0 }
  0xe3   :  { %v1423_v61 = vpop.f32.mrf.mxu0  ;;  %v1461_v62 = vpop.f32.mrf.mxu1 }
  0xe5   :  { %v1424_v63 = vpop.f32.mrf.mxu0  ;;  %v1462_v0 = vpop.f32.mrf.mxu1 }
  0xe6   :  { %v1425_v1 = vadd.f32 %v1424_v63, %v1423_v61  ;;  %v1463_v2 = vadd.f32 %v1462_v0, %v1461_v62 }
  0xe7   :  { %v1426_v3 = vpop.f32.mrf.mxu0  ;;  %v1464_v4 = vpop.f32.mrf.mxu1 }
  0xe8   :  { %1579 = vmatprep.mubr.f32.mxu0 %v1425_v1  ;;  %1614 = vmatprep.mubr.f32.mxu1 %v1463_v2 }
  0xe9   :  { %v1427_v5 = vpop.f32.mrf.mxu0  ;;  %v1465_v6 = vpop.f32.mrf.mxu1 }
  0xea   :  { %v1428_v7 = vadd.f32 %v1427_v5, %v1426_v3  ;;  %v1466_v8 = vadd.f32 %v1465_v6, %v1464_v4 }
  0xec   :  { %1580 = vmatmul.mubr.f32.vlgmr.msra.gmra.mxu0 %v1428_v7  ;;  %1615 = vmatmul.mubr.f32.vlgmr.msra.gmra.mxu1 %v1466_v8 }
  0xed   :  { %1621 = vmatprep.mubr.msk.f32.mxu0 %vm481_vm2, %v479_v25  ;;  %1628 = vmatprep.mubr.msk.f32.mxu1 %vm481_vm2, %v479_v25 }
 0x1ac   :  { %v1581_v28 = vpop.f32.mrf.mxu0  ;;  %v1616_v29 = vpop.f32.mrf.mxu1 }
 0x1ad   :  { %v323_v30 = vadd.f32 %v1581_v28, %v1352_v27  ;;  %v398_v31 = vadd.f32 %v1616_v29, %v1352_v27 }
 0x1ae   :  { %v317_v32 = vpop.f32.mrf.mxu0  ;;  %v392_v33 = vpop.f32.mrf.mxu1 }
 0x1af   :  { %v318_v34 = vadd.f32 %v1352_v27, %v317_v32  ;;  %v393_v35 = vadd.f32 %v1352_v27, %v392_v33  ;;  %v402_v36 = vmul.f32 %v323_v30, %v323_v30  ;;  %v411_v37 = vmul.f32 %v398_v31, %v398_v31 }
 0x1b1   :  { %v401_v38 = vmul.f32 %v318_v34, %v318_v34  ;;  %v410_v39 = vmul.f32 %v393_v35, %v393_v35 }
 0x1b3   :  { %v403_v40 = vadd.f32 %v402_v36, %v401_v38  ;;  %v412_v41 = vadd.f32 %v411_v37, %v410_v39 }
 0x1b5   :  { %v404_v42 = vrot.slane %v403_v40, 4  ;;  %v413_v43 = vrot.slane %v412_v41, 4 }
 0x1b7   :  { %v405_v44 = vadd.f32 %v404_v42, %v403_v40  ;;  %v414_v45 = vadd.f32 %v413_v43, %v412_v41 }
 0x1b9   :  { %v406_v46 = vrot.slane %v405_v44, 2  ;;  %v415_v47 = vrot.slane %v414_v45, 2 }
 0x1bb   :  { %v407_v48 = vadd.f32 %v406_v46, %v405_v44  ;;  %v416_v49 = vadd.f32 %v415_v47, %v414_v45 }
 0x1bd   :  { %v408_v50 = vrot.slane %v407_v48, 1  ;;  %v417_v51 = vrot.slane %v416_v49, 1 }
 0x1bf   :  { %v409_v52 = vadd.f32 %v408_v50, %v407_v48  ;;  %v418_v53 = vadd.f32 %v417_v51, %v416_v49 }
 0x1c1   :  { %v419_v54 = vadd.f32 %v418_v53, %v409_v52 }
 0x1c3   :  { %v420_v55 = vmul.f32 0.03125, %v419_v54 }
 0x1c5   :  { %421 = vst [vmem:[%s2309_s12] sm:$0x1] %v420_v55  ;;  %v422_v56 = vmax.f32 %v420_v55, 1e-30 }
 0x1c7   :  { %1703 = vrsqrt.f32 %v422_v56 }
 0x1d4   :  { %v1704_v57 = vpop.eup %1703 }
 0x1d5   :  { %v424_v58 = vmul.f32 3.1622777, %v1704_v57 }
 0x1d7   :  { %v427_v59 = vmul.f32 %v424_v58, %v393_v35  ;;  %v428_v60 = vmul.f32 %v424_v58, %v398_v31  ;;  %v426_v61 = vmul.f32 %v424_v58, %v323_v30  ;;  %v425_v62 = vmul.f32 %v424_v58, %v318_v34 }
 0x1d8   :  { %v1088_v35 = vlaneseq }
 0x1d9   :  { %1624 = vmatprep.subr.mxu1 %v428_v60  ;;  %638 = vxpose.xlu0.b32.start [1/2] (short) %v427_v59, 128 }
 0x1da   :  { %1617 = vmatprep.subr.mxu0 %v426_v61  ;;  %863 = vxpose.xlu1.b32.start [1/2] (short) %v425_v62, 128  ;;  %v1089_v36 = vshrl.u32 %v1088_v35, 7  ;;  %v2021_v38 = vand.u32 127, %v1088_v35 }
 0x1db   :  { %1618 = vmatpush3.msra.mxu0 %v426_v61  ;;  %1625 = vmatpush3.msra.mxu1 %v428_v60 }
 0x1dc   :  { %1619 = vmatprep.subr.mxu0 %v425_v62  ;;  %1626 = vmatprep.subr.mxu1 %v427_v59  ;;  %v1090_v37 = vadd.s32 8, %v1089_v36  ;;  %v2023_v39 = vadd.s32 24, %v1089_v36  ;;  %v2025_v40 = vadd.s32 16, %v1089_v36  ;;  %v2027_v41 = vadd.s32 40, %v1089_v36 }
 0x1dd   :  { %1620 = vmatpush3.msra.mxu0 %v425_v62  ;;  %1627 = vmatpush3.msra.mxu1 %v427_v59  ;;  %v2029_v42 = vadd.s32 32, %v1089_v36  ;;  %vm1107_vm5 = vcmp.eq.s32.totalorder %v1089_v36, %v2021_v38  ;;  %vm1163_vm6 = vcmp.gt.s32.totalorder %v2021_v38, %v1089_v36  ;;  %v2043_v45 = vadd.s32 48, %v1089_v36 }
 0x1de   :  { %639 = vxpose.xlu0.b32.end [2/2] (short) %v428_v60, 128  ;;  %1629 = vmatmul.mubr.msk.f32.vlgmr.msra.gmra.mxu1 %vm481_vm2, %v480_v26  ;;  %vm1108_vm3 = vcmp.eq.s32.totalorder %v1090_v37, %v2021_v38  ;;  %vm1164_vm4 = vcmp.gt.s32.totalorder %v2021_v38, %v1090_v37  ;;  %vm1110_vm7 = vcmp.eq.s32.totalorder %v2023_v39, %v2021_v38  ;;  %v2054_v47 = vadd.s32 56, %v1089_v36 }
 0x1df   :  { %864 = vxpose.xlu1.b32.end [2/2] (short) %v426_v61, 128  ;;  %1622 = vmatmul.mubr.msk.f32.vlgmr.msra.gmra.mxu0 %vm481_vm2, %v480_v26  ;;  %vm1166_vm8 = vcmp.gt.s32.totalorder %v2021_v38, %v2023_v39  ;;  %vm1109_vm9 = vcmp.eq.s32.totalorder %v2025_v40, %v2021_v38  ;;  %vm1165_vm10 = vcmp.gt.s32.totalorder %v2021_v38, %v2025_v40  ;;  %v2056_v48 = vadd.s32 72, %v1089_v36 }
 0x1e0   :  { %vm1112_vm11 = vcmp.eq.s32.totalorder %v2027_v41, %v2021_v38  ;;  %vm1111_vm12 = vcmp.eq.s32.totalorder %v2029_v42, %v2021_v38  ;;  %vm1167_vm13 = vcmp.gt.s32.totalorder %v2021_v38, %v2029_v42  ;;  %vm1168_vm14 = vcmp.gt.s32.totalorder %v2021_v38, %v2027_v41 }
 0x1e1   :  { %v2060_v53 = vadd.s32 64, %v1089_v36  ;;  %v2067_v57 = vadd.s32 88, %v1089_v36  ;;  %v2069_v58 = vadd.s32 80, %v1089_v36  ;;  %vm1113_vm15 = vcmp.eq.s32.totalorder %v2043_v45, %v2021_v38 }
 0x1e2   :  { %v2075_v61 = vadd.s32 104, %v1089_v36  ;;  %v2077_v62 = vadd.s32 96, %v1089_v36  ;;  %vm1114_vm0 = vcmp.eq.s32.totalorder %v2054_v47, %v2021_v38  ;;  %vm1169_vm1 = vcmp.gt.s32.totalorder %v2021_v38, %v2043_v45 }
 0x256   :  { %v654_v63 = vpop.trf.xlu0 }
 0x257   :  { %v879_v0 = vpop.trf.xlu1  ;;  %1635 = vmatprep.mubr.msk.f32.mxu0 %vm481_vm2, %v654_v63  ;;  %v2079_v63 = vadd.s32 120, %v1089_v36 }
 0x258   :  { %1663 = vmatprep.mubr.msk.f32.mxu1 %vm481_vm2, %v879_v0 }
 0x25a   :  { %v655_v2 = vpop.trf.xlu0 }
 0x25b   :  { %v880_v1 = vpop.trf.xlu1 }
 0x25e   :  { %v656_v4 = vpop.trf.xlu0 }
 0x25f   :  { %v881_v3 = vpop.trf.xlu1 }
 0x262   :  { %v657_v6 = vpop.trf.xlu0 }
 0x263   :  { %v882_v5 = vpop.trf.xlu1 }
 0x266   :  { %v658_v8 = vpop.trf.xlu0 }
 0x267   :  { %v883_v7 = vpop.trf.xlu1 }
 0x26a   :  { %v659_v10 = vpop.trf.xlu0 }
 0x26b   :  { %v884_v9 = vpop.trf.xlu1 }
 0x26e   :  { %v660_v12 = vpop.trf.xlu0 }
 0x26f   :  { %v885_v11 = vpop.trf.xlu1 }
 0x272   :  { %v661_v14 = vpop.trf.xlu0 }
 0x273   :  { %v886_v13 = vpop.trf.xlu1 }
 0x276   :  { %v662_v16 = vpop.trf.xlu0 }
 0x277   :  { %v887_v15 = vpop.trf.xlu1 }
 0x27a   :  { %v663_v18 = vpop.trf.xlu0 }
 0x27b   :  { %v888_v17 = vpop.trf.xlu1 }
 0x27e   :  { %v664_v22 = vpop.trf.xlu0 }
 0x27f   :  { %v889_v20 = vpop.trf.xlu1 }
 0x282   :  { %v665_v26 = vpop.trf.xlu0 }
 0x283   :  { %v890_v25 = vpop.trf.xlu1 }
 0x286   :  { %v666_v28 = vpop.trf.xlu0 }
 0x287   :  { %v891_v27 = vpop.trf.xlu1 }
 0x28a   :  { %v667_v30 = vpop.trf.xlu0 }
 0x28b   :  { %v892_v29 = vpop.trf.xlu1 }
 0x28e   :  { %v668_v32 = vpop.trf.xlu0 }
 0x28f   :  { %v893_v31 = vpop.trf.xlu1 }
 0x292   :  { %v669_v34 = vpop.trf.xlu0 }
 0x293   :  { %v894_v33 = vpop.trf.xlu1 }
 0x29e   :  { %v1630_v19 = vpop.f32.mrf.mxu1 }
 0x29f   :  { %v1623_v21 = vpop.f32.mrf.mxu0  ;;  %1659 = vmatprep.subr.mxu1 %v1630_v19 }
 0x2a0   :  { %1631 = vmatprep.subr.mxu0 %v1623_v21  ;;  %v629_v23 = vpop.f32.mrf.mxu1  ;;  %1660 = vmatpush3.msra.mxu1 %v1630_v19 }
 0x2a1   :  { %v554_v24 = vpop.f32.mrf.mxu0  ;;  %1632 = vmatpush3.msra.mxu0 %v1623_v21  ;;  %1661 = vmatprep.subr.mxu1 %v629_v23 }
 0x2a2   :  { %1633 = vmatprep.subr.mxu0 %v554_v24  ;;  %1662 = vmatpush3.msra.mxu1 %v629_v23 }
 0x2a3   :  { %1634 = vmatpush3.msra.mxu0 %v554_v24  ;;  %1664 = vmatmul.mubr.msk.f32.vlgmr.msra.gmra.mxu1 %vm481_vm2, %v880_v1 }
 0x2a4   :  { %1636 = vmatmul.mubr.msk.f32.vlgmr.msra.gmra.mxu0 %vm481_vm2, %v655_v2  ;;  %1666 = vmatprep.mubr.msk.f32.mxu1 %vm481_vm2, %v881_v3 }
 0x2a5   :  { %1638 = vmatprep.mubr.msk.f32.mxu0 %vm481_vm2, %v656_v4  ;;  %v2092_v4 = vadd.s32 112, %v1089_v36 }
 0x2a7   :  { %1667 = vmatmul.mubr.msk.f32.gmra.mxu1 %vm481_vm2, %v882_v5 }
 0x2a8   :  { %1639 = vmatmul.mubr.msk.f32.gmra.mxu0 %vm481_vm2, %v657_v6  ;;  %1669 = vmatprep.mubr.msk.f32.mxu1 %vm481_vm2, %v883_v7 }
 0x2a9   :  { %1641 = vmatprep.mubr.msk.f32.mxu0 %vm481_vm2, %v658_v8 }
 0x2ab   :  { %1670 = vmatmul.mubr.msk.f32.gmra.mxu1 %vm481_vm2, %v884_v9 }
 0x2ac   :  { %1642 = vmatmul.mubr.msk.f32.gmra.mxu0 %vm481_vm2, %v659_v10  ;;  %1672 = vmatprep.mubr.msk.f32.mxu1 %vm481_vm2, %v885_v11 }
 0x2ad   :  { %1644 = vmatprep.mubr.msk.f32.mxu0 %vm481_vm2, %v660_v12 }
 0x2af   :  { %1673 = vmatmul.mubr.msk.f32.gmra.mxu1 %vm481_vm2, %v886_v13 }
 0x2b0   :  { %1645 = vmatmul.mubr.msk.f32.gmra.mxu0 %vm481_vm2, %v661_v14  ;;  %1675 = vmatprep.mubr.msk.f32.mxu1 %vm481_vm2, %v887_v15 }
 0x2b1   :  { %1647 = vmatprep.mubr.msk.f32.mxu0 %vm481_vm2, %v662_v16 }
 0x2b3   :  { %1676 = vmatmul.mubr.msk.f32.gmra.mxu1 %vm481_vm2, %v888_v17 }
 0x2b4   :  { %1648 = vmatmul.mubr.msk.f32.gmra.mxu0 %vm481_vm2, %v663_v18  ;;  %1678 = vmatprep.mubr.msk.f32.mxu1 %vm481_vm2, %v889_v20 }
 0x2b5   :  { %1650 = vmatprep.mubr.msk.f32.mxu0 %vm481_vm2, %v664_v22 }
 0x2b7   :  { %1679 = vmatmul.mubr.msk.f32.gmra.mxu1 %vm481_vm2, %v890_v25 }
 0x2b8   :  { %1651 = vmatmul.mubr.msk.f32.gmra.mxu0 %vm481_vm2, %v665_v26  ;;  %1681 = vmatprep.mubr.msk.f32.mxu1 %vm481_vm2, %v891_v27 }
 0x2b9   :  { %1653 = vmatprep.mubr.msk.f32.mxu0 %vm481_vm2, %v666_v28 }
 0x2bb   :  { %1682 = vmatmul.mubr.msk.f32.gmra.mxu1 %vm481_vm2, %v892_v29 }
 0x2bc   :  { %1654 = vmatmul.mubr.msk.f32.gmra.mxu0 %vm481_vm2, %v667_v30  ;;  %1684 = vmatprep.mubr.msk.f32.mxu1 %vm481_vm2, %v893_v31 }
 0x2bd   :  { %1656 = vmatprep.mubr.msk.f32.mxu0 %vm481_vm2, %v668_v32 }
 0x2bf   :  { %1685 = vmatmul.mubr.msk.f32.gmra.mxu1 %vm481_vm2, %v894_v33 }
 0x2c0   :  { %1657 = vmatmul.mubr.msk.f32.gmra.mxu0 %vm481_vm2, %v669_v34  ;;  %vm1170_vm2 = vcmp.gt.s32.totalorder %v2021_v38, %v2054_v47 }
 0x363   :  { %v1665_v43 = vpop.f32.mrf.mxu1 }
 0x364   :  { %v1637_v44 = vpop.f32.mrf.mxu0  ;;  %v1236_v50 = vmul.f32 %v1665_v43, %v1665_v43 }
 0x365   :  { %1293 = vst [vmem:[%s2306_s9 + $0x8] sm:$0xff] %v1637_v44  ;;  %v1009_v46 = vpop.f32.mrf.mxu1  ;;  %v1180_v49 = vmul.f32 %v1637_v44, %v1637_v44  ;;  %v1124_v0 = vsel %vm1108_vm3, %v1637_v44, 0.0  ;;  %vm1115_vm3 = vcmp.eq.s32.totalorder %v2060_v53, %v2021_v38 }
 0x366   :  { %v784_v51 = vpop.f32.mrf.mxu0  ;;  %v1235_v52 = vmul.f32 %v1009_v46, %v1009_v46  ;;  %v1252_v6 = vsel %vm1164_vm4, %v1236_v50, 0.0 }
 0x367   :  { %v1123_v54 = vsel %vm1107_vm5, %v784_v51, 0.0  ;;  %v1179_v55 = vmul.f32 %v784_v51, %v784_v51  ;;  %1292 = vst [vmem:[%s2306_s9] sm:$0xff] %v784_v51  ;;  %v1668_v56 = vpop.f32.mrf.mxu1  ;;  %v1196_v5 = vsel %vm1164_vm4, %v1180_v49, 0.0  ;;  %vm1116_vm4 = vcmp.eq.s32.totalorder %v2056_v48, %v2021_v38 }
 0x368   :  { %v1251_v59 = vsel %vm1163_vm6, %v1235_v52, 0.0  ;;  %v1640_v60 = vpop.f32.mrf.mxu0  ;;  %v1238_v2 = vmul.f32 %v1668_v56, %v1668_v56  ;;  %v1139_v7 = vadd.f32 %v1124_v0, %v1123_v54  ;;  %vm1171_vm5 = vcmp.gt.s32.totalorder %v2021_v38, %v2060_v53 }
 0x369   :  { %v1195_v1 = vsel %vm1163_vm6, %v1179_v55, 0.0  ;;  %1295 = vst [vmem:[%s2306_s9 + $0x18] sm:$0xff] %v1640_v60  ;;  %v1019_v3 = vpop.f32.mrf.mxu1  ;;  %v1267_v10 = vadd.f32 %v1252_v6, %v1251_v59  ;;  %v1182_v11 = vmul.f32 %v1640_v60, %v1640_v60  ;;  %v1126_v16 = vsel %vm1110_vm7, %v1640_v60, 0.0 }
 0x36a   :  { %v794_v8 = vpop.f32.mrf.mxu0  ;;  %v1237_v9 = vmul.f32 %v1019_v3, %v1019_v3  ;;  %v1211_v15 = vadd.f32 %v1196_v5, %v1195_v1  ;;  %v1254_v20 = vsel %vm1166_vm8, %v1238_v2, 0.0  ;;  %vm1172_vm6 = vcmp.gt.s32.totalorder %v2021_v38, %v2056_v48 }
 0x36b   :  { %v1125_v12 = vsel %vm1109_vm9, %v794_v8, 0.0  ;;  %v1181_v13 = vmul.f32 %v794_v8, %v794_v8  ;;  %1294 = vst [vmem:[%s2306_s9 + $0x10] sm:$0xff] %v794_v8  ;;  %v1671_v14 = vpop.f32.mrf.mxu1  ;;  %v1198_v30 = vsel %vm1166_vm8, %v1182_v11, 0.0  ;;  %vm1117_vm7 = vcmp.eq.s32.totalorder %v2069_v58, %v2021_v38 }
 0x36c   :  { %v1140_v17 = vadd.f32 %v1139_v7, %v1125_v12  ;;  %v1253_v18 = vsel %vm1165_vm10, %v1237_v9, 0.0  ;;  %v1643_v19 = vpop.f32.mrf.mxu0  ;;  %v1240_v23 = vmul.f32 %v1671_v14, %v1671_v14  ;;  %vm1118_vm8 = vcmp.eq.s32.totalorder %v2067_v57, %v2021_v38 }
 0x36d   :  { %v1197_v21 = vsel %vm1165_vm10, %v1181_v13, 0.0  ;;  %v1268_v22 = vadd.f32 %v1267_v10, %v1253_v18  ;;  %1297 = vst [vmem:[%s2306_s9 + $0x28] sm:$0xff] %v1643_v19  ;;  %v1029_v24 = vpop.f32.mrf.mxu1  ;;  %v1184_v26 = vmul.f32 %v1643_v19, %v1643_v19  ;;  %v1128_v35 = vsel %vm1112_vm11, %v1643_v19, 0.0 }
 0x36e   :  { %v1212_v25 = vadd.f32 %v1211_v15, %v1197_v21  ;;  %v804_v27 = vpop.f32.mrf.mxu0  ;;  %v1141_v28 = vadd.f32 %v1140_v17, %v1126_v16  ;;  %v1239_v29 = vmul.f32 %v1029_v24, %v1029_v24  ;;  %v1256_v43 = vsel %vm1168_vm14, %v1240_v23, 0.0 }
 0x36f   :  { %v1127_v31 = vsel %vm1111_vm12, %v804_v27, 0.0  ;;  %v1183_v32 = vmul.f32 %v804_v27, %v804_v27  ;;  %1296 = vst [vmem:[%s2306_s9 + $0x20] sm:$0xff] %v804_v27  ;;  %v1269_v33 = vadd.f32 %v1268_v22, %v1254_v20  ;;  %v1674_v34 = vpop.f32.mrf.mxu1  ;;  %vm1173_vm9 = vcmp.gt.s32.totalorder %v2021_v38, %v2069_v58 }
 0x370   :  { %v1142_v36 = vadd.f32 %v1141_v28, %v1127_v31  ;;  %v1213_v37 = vadd.f32 %v1212_v25, %v1198_v30  ;;  %v1255_v39 = vsel %vm1167_vm13, %v1239_v29, 0.0  ;;  %v1646_v40 = vpop.f32.mrf.mxu0  ;;  %v1242_v49 = vmul.f32 %v1674_v34, %v1674_v34 }
 0x371   :  { %v1199_v44 = vsel %vm1167_vm13, %v1183_v32, 0.0  ;;  %v1270_v46 = vadd.f32 %v1269_v33, %v1255_v39  ;;  %1299 = vst [vmem:[%s2306_s9 + $0x38] sm:$0xff] %v1646_v40  ;;  %v1039_v50 = vpop.f32.mrf.mxu1  ;;  %v1200_v51 = vsel %vm1168_vm14, %v1184_v26, 0.0  ;;  %vm1174_vm10 = vcmp.gt.s32.totalorder %v2021_v38, %v2067_v57 }
 0x372   :  { %v1214_v52 = vadd.f32 %v1213_v37, %v1199_v44  ;;  %v814_v42 = vpop.f32.mrf.mxu0  ;;  %v1143_v54 = vadd.f32 %v1142_v36, %v1128_v35  ;;  %v1241_v55 = vmul.f32 %v1039_v50, %v1039_v50  ;;  %v1186_v56 = vmul.f32 %v1646_v40, %v1646_v40 }
 0x373   :  { %v1129_v59 = vsel %vm1113_vm15, %v814_v42, 0.0  ;;  %v1185_v60 = vmul.f32 %v814_v42, %v814_v42  ;;  %1298 = vst [vmem:[%s2306_s9 + $0x30] sm:$0xff] %v814_v42  ;;  %v1271_v0 = vadd.f32 %v1270_v46, %v1256_v43  ;;  %v1677_v41 = vpop.f32.mrf.mxu1  ;;  %v1130_v1 = vsel %vm1114_vm0, %v1646_v40, 0.0 }
 0x374   :  { %v1144_v2 = vadd.f32 %v1143_v54, %v1129_v59  ;;  %v1215_v3 = vadd.f32 %v1214_v52, %v1200_v51  ;;  %v1257_v5 = vsel %vm1169_vm1, %v1241_v55, 0.0  ;;  %v1649_v6 = vpop.f32.mrf.mxu0  ;;  %vm1119_vm11 = vcmp.eq.s32.totalorder %v2077_v62, %v2021_v38 }
 0x375   :  { %v1258_v7 = vsel %vm1170_vm2, %v1242_v49, 0.0  ;;  %v1201_v8 = vsel %vm1169_vm1, %v1185_v60, 0.0  ;;  %v1272_v9 = vadd.f32 %v1271_v0, %v1257_v5  ;;  %1301 = vst [vmem:[%s2306_s9 + $0x48] sm:$0xff] %v1649_v6  ;;  %v1244_v10 = vmul.f32 %v1677_v41, %v1677_v41  ;;  %v1049_v11 = vpop.f32.mrf.mxu1 }
 0x376   :  { %vm1175_vm12 = vcmp.gt.s32.totalorder %v2021_v38, %v2077_v62  ;;  %v1216_v12 = vadd.f32 %v1215_v3, %v1201_v8  ;;  %v1188_v13 = vmul.f32 %v1649_v6, %v1649_v6  ;;  %v824_v14 = vpop.f32.mrf.mxu0  ;;  %v1145_v15 = vadd.f32 %v1144_v2, %v1130_v1 }
 0x377   :  { %v1243_v16 = vmul.f32 %v1049_v11, %v1049_v11  ;;  %vm1120_vm13 = vcmp.eq.s32.totalorder %v2075_v61, %v2021_v38  ;;  %vm1176_vm14 = vcmp.gt.s32.totalorder %v2021_v38, %v2075_v61  ;;  %v1202_v45 = vsel %vm1170_vm2, %v1186_v56, 0.0  ;;  %1300 = vst [vmem:[%s2306_s9 + $0x40] sm:$0xff] %v824_v14  ;;  %v1680_v20 = vpop.f32.mrf.mxu1 }
 0x378   :  { %v1131_v17 = vsel %vm1115_vm3, %v824_v14, 0.0  ;;  %v1187_v18 = vmul.f32 %v824_v14, %v824_v14  ;;  %v1273_v19 = vadd.f32 %v1272_v9, %v1258_v7  ;;  %v1132_v21 = vsel %vm1116_vm4, %v1649_v6, 0.0  ;;  %v1652_v24 = vpop.f32.mrf.mxu0 }
 0x379   :  { %v1146_v22 = vadd.f32 %v1145_v15, %v1131_v17  ;;  %v1217_v23 = vadd.f32 %v1216_v12, %v1202_v45  ;;  %v1259_v47 = vsel %vm1171_vm5, %v1243_v16, 0.0  ;;  %vm1121_vm15 = vcmp.eq.s32.totalorder %v2092_v4, %v2021_v38  ;;  %1303 = vst [vmem:[%s2306_s9 + $0x58] sm:$0xff] %v1652_v24  ;;  %v1059_v29 = vpop.f32.mrf.mxu1 }
 0x37a   :  { %v1260_v25 = vsel %vm1172_vm6, %v1244_v10, 0.0  ;;  %v1203_v26 = vsel %vm1171_vm5, %v1187_v18, 0.0  ;;  %v1274_v27 = vadd.f32 %v1273_v19, %v1259_v47  ;;  %v1246_v28 = vmul.f32 %v1680_v20, %v1680_v20  ;;  %v834_v32 = vpop.f32.mrf.mxu0 }
 0x37b   :  { %v1204_v30 = vsel %vm1172_vm6, %v1188_v13, 0.0  ;;  %v1218_v31 = vadd.f32 %v1217_v23, %v1203_v26  ;;  %v1147_v33 = vadd.f32 %v1146_v22, %v1132_v21  ;;  %v1245_v34 = vmul.f32 %v1059_v29, %v1059_v29  ;;  %1302 = vst [vmem:[%s2306_s9 + $0x50] sm:$0xff] %v834_v32  ;;  %v1683_v48 = vpop.f32.mrf.mxu1 }
 0x37c   :  { %vm1122_vm0 = vcmp.eq.s32.totalorder %v2079_v63, %v2021_v38  ;;  %v1190_v53 = vmul.f32 %v1652_v24, %v1652_v24  ;;  %v1133_v35 = vsel %vm1117_vm7, %v834_v32, 0.0  ;;  %v1189_v36 = vmul.f32 %v834_v32, %v834_v32  ;;  %v1655_v46 = vpop.f32.mrf.mxu0 }
 0x37d   :  { %v1275_v37 = vadd.f32 %v1274_v27, %v1260_v25  ;;  %v1134_v39 = vsel %vm1118_vm8, %v1652_v24, 0.0  ;;  %v1148_v40 = vadd.f32 %v1147_v33, %v1133_v35  ;;  %v1219_v43 = vadd.f32 %v1218_v31, %v1204_v30  ;;  %1305 = vst [vmem:[%s2306_s9 + $0x68] sm:$0xff] %v1655_v46  ;;  %v1069_v42 = vpop.f32.mrf.mxu1 }
 0x37e   :  { %v1261_v44 = vsel %vm1173_vm9, %v1245_v34, 0.0  ;;  %v1262_v49 = vsel %vm1174_vm10, %v1246_v28, 0.0  ;;  %v1205_v50 = vsel %vm1173_vm9, %v1189_v36, 0.0  ;;  %v1248_v52 = vmul.f32 %v1683_v48, %v1683_v48  ;;  %v844_v56 = vpop.f32.mrf.mxu0 }
 0x37f   :  { %v1276_v51 = vadd.f32 %v1275_v37, %v1261_v44  ;;  %v1220_v54 = vadd.f32 %v1219_v43, %v1205_v50  ;;  %v1192_v55 = vmul.f32 %v1655_v46, %v1655_v46  ;;  %v1149_v59 = vadd.f32 %v1148_v40, %v1134_v39  ;;  %1304 = vst [vmem:[%s2306_s9 + $0x60] sm:$0xff] %v844_v56  ;;  %v1686_v2 = vpop.f32.mrf.mxu1 }
 0x380   :  { %v1247_v60 = vmul.f32 %v1069_v42, %v1069_v42  ;;  %v1206_v0 = vsel %vm1174_vm10, %v1190_v53, 0.0  ;;  %v1135_v58 = vsel %vm1119_vm11, %v844_v56, 0.0  ;;  %v1191_v41 = vmul.f32 %v844_v56, %v844_v56  ;;  %v1658_v7 = vpop.f32.mrf.mxu0 }
 0x381   :  { %v1277_v1 = vadd.f32 %v1276_v51, %v1262_v49  ;;  %v1150_v3 = vadd.f32 %v1149_v59, %v1135_v58  ;;  %v1221_v5 = vadd.f32 %v1220_v54, %v1206_v0  ;;  %vm1177_vm1 = vcmp.gt.s32.totalorder %v2021_v38, %v2092_v4  ;;  %1307 = vst [vmem:[%s2306_s9 + $0x78] sm:$0xff] %v1658_v7  ;;  %v1079_v11 = vpop.f32.mrf.mxu1 }
 0x382   :  { %v1263_v6 = vsel %vm1175_vm12, %v1247_v60, 0.0  ;;  %v1136_v57 = vsel %vm1120_vm13, %v1655_v46, 0.0  ;;  %v1264_v8 = vsel %vm1176_vm14, %v1248_v52, 0.0  ;;  %v1207_v9 = vsel %vm1175_vm12, %v1191_v41, 0.0  ;;  %v854_v14 = vpop.f32.mrf.mxu0 }
 0x383   :  { %v1278_v10 = vadd.f32 %v1277_v1, %v1263_v6  ;;  %v1208_v12 = vsel %vm1176_vm14, %v1192_v55, 0.0  ;;  %v1222_v13 = vadd.f32 %v1221_v5, %v1207_v9  ;;  %v1151_v15 = vadd.f32 %v1150_v3, %v1136_v57  ;;  %1306 = vst [vmem:[%s2306_s9 + $0x70] sm:$0xff] %v854_v14 }
 0x384   :  { %v1249_v16 = vmul.f32 %v1079_v11, %v1079_v11  ;;  %v1194_v45 = vmul.f32 %v1658_v7, %v1658_v7  ;;  %v1137_v62 = vsel %vm1121_vm15, %v854_v14, 0.0  ;;  %v1193_v17 = vmul.f32 %v854_v14, %v854_v14 }
 0x385   :  { %v1279_v18 = vadd.f32 %v1278_v10, %v1264_v8  ;;  %v1152_v19 = vadd.f32 %v1151_v15, %v1137_v62  ;;  %vm1178_vm2 = vcmp.gt.s32.totalorder %v2021_v38, %v2079_v63  ;;  %v1223_v20 = vadd.f32 %v1222_v13, %v1208_v12 }
 0x386   :  { %v1265_v61 = vsel %vm1177_vm1, %v1249_v16, 0.0  ;;  %v1250_v21 = vmul.f32 %v1686_v2, %v1686_v2  ;;  %v1209_v22 = vsel %vm1177_vm1, %v1193_v17, 0.0  ;;  %v1138_v23 = vsel %vm1122_vm0, %v1658_v7, 0.0 }
 0x387   :  { %v1280_v47 = vadd.f32 %v1279_v18, %v1265_v61  ;;  %v1153_v24 = vadd.f32 %v1152_v19, %v1138_v23  ;;  %v1224_v25 = vadd.f32 %v1223_v20, %v1209_v22  ;;  %v1210_v26 = vsel %vm1178_vm2, %v1194_v45, 0.0 }
 0x388   :  { %v1266_v28 = vsel %vm1178_vm2, %v1250_v21, 0.0 }
 0x389   :  { %1154 = vadd.xlane.f32.xlu0 %v1153_v24  ;;  %v1225_v27 = vadd.f32 %v1224_v25, %v1210_v26  ;;  %v1281_v29 = vadd.f32 %v1280_v47, %v1266_v28 }
 0x38b   :  { %1226 = vadd.xlane.f32.xlu1 %v1225_v27 }
 0x38d   :  { %1282 = vadd.xlane.f32.xlu0 %v1281_v29 }
 0x412   :  { %v1155_v30 = vpop.xlane.xlu0 %1154 }
 0x413   :  { %v1156_v31 = vrot.slane %v1155_v30, 4 }
 0x414   :  { %v1227_v32 = vpop.xlane.xlu1 %1226 }
 0x415   :  { %v1157_v33 = vadd.f32 %v1156_v31, %v1155_v30  ;;  %v1228_v4 = vrot.slane %v1227_v32, 4 }
 0x416   :  { %v1283_v34 = vpop.xlane.xlu0 %1282 }
 0x417   :  { %v1158_v53 = vrot.slane %v1157_v33, 2  ;;  %v1229_v35 = vadd.f32 %v1228_v4, %v1227_v32  ;;  %v1284_v38 = vrot.slane %v1283_v34, 4 }
 0x419   :  { %v1230_v63 = vrot.slane %v1229_v35, 2  ;;  %v1285_v36 = vadd.f32 %v1284_v38, %v1283_v34  ;;  %v1159_v37 = vadd.f32 %v1158_v53, %v1157_v33 }
 0x41b   :  { %v1231_v48 = vadd.f32 %v1230_v63, %v1229_v35  ;;  %v1286_v39 = vrot.slane %v1285_v36, 2  ;;  %v1160_v40 = vrot.slane %v1159_v37, 1 }
 0x41d   :  { %v1287_v43 = vadd.f32 %v1286_v39, %v1285_v36  ;;  %v1161_v44 = vadd.f32 %v1160_v40, %v1159_v37  ;;  %v1232_v46 = vrot.slane %v1231_v48, 1 }
 0x41f   :  { %1687 = vpush %v1161_v44  ;;  %v1233_v49 = vadd.f32 %v1232_v46, %v1231_v48  ;;  %v1288_v50 = vrot.slane %v1287_v43, 1 }
 0x421   :  { %1689 = vpush %v1233_v49  ;;  %v1289_v51 = vadd.f32 %v1288_v50, %v1287_v43 }
 0x423   :  { %1691 = vpush %v1289_v51 }
 0x450   :  { %s1688_s9 = spop %1687 }
 0x451   :  { %s1308_s13 = smul.f32 -2.0, %s1688_s9 }
 0x452   :  { %s1690_s14 = spop %1689 }
 0x453   :  { %s1311_s15 = smul.f32 0.0625, %s1308_s13 }
 0x454   :  { %s1692_s0 = spop %1691 }
 0x455   :  { %s1291_s1 = sadd.f32 %s1692_s0, %s1690_s14 }
 0x456   :  { %1313 = sst [smem:[#allocation2]] %s1311_s15 }
 0x457   :  { %s1316_s16 = smul.f32 0.0625, %s1291_s1 }
 0x458   :  { %1328 = dma.smem_to_hbm %s1726_s17, 16, %s2307_s10, [#allocation3]  }
 0x459   :  { %1318 = sst [smem:[#allocation4]] %s1316_s16 }
 0x45a   :  { %1336 = dma.smem_to_hbm %s1727_s20, 16, %s2308_s11, [#allocation5]  }
 0x45b   :  { %1721 = dma.done.wait [#allocation3], 16  }
 0x45c   :  { %1722 = vsyncadd [#allocation3], 4294967280 }
 0x45d   :  { %1723 = dma.done.wait [#allocation5], 16  }
 0x45e   :  { %1724 = vsyncadd [#allocation5], 4294967280 }
 0x45f   :  { %1349 = sfence }
 0x460   :  { %1350 = vsyncpa [#allocation3], 1 }
 0x461   :  { %1351 = vsyncpa [#allocation5], 1 }

</bundles_post_ra>
